<compile_context>
chip_gen: v5e
topology: v5e:2x2
jax: 0.10.0
libtpu: 0.0.40
codegen_flags: <defaults>
</compile_context>

<pallas_src>
import jax
import jax.numpy as jnp
from jax.experimental import pallas as pl
from jax.experimental.pallas import tpu as pltpu


def _round_up(x, m):
    return (x + m - 1) // m * m


def _make_critic_kernel(state_dim, action_dim, hp):
    """Build the kernel with static packed-slab row offsets baked in."""
    sp = _round_up(state_dim, 16)     # bf16 rows pack in sublane pairs; 16-align
    o_w2 = sp
    o_w3 = sp + hp
    o_w4 = sp + 2 * hp

    def kernel(state_ref, action_ref, w_ref, b_ref, out_ref):
        s = state_ref[...].astype(jnp.bfloat16)                 # (TB, state_dim)

        # layer 1: state via MXU dot; action via VPU broadcast-FMAs on the
        # f32 W1_action rows kept in the bias slab (rows 4..4+action_dim-1).
        h = jnp.dot(s, w_ref[0:state_dim, :],
                    preferred_element_type=jnp.float32)         # (TB, hp) f32
        h = h + b_ref[0:1, :]
        for j in range(action_dim):                             # tiny K -> VPU
            h = h + action_ref[:, j:j + 1] * b_ref[4 + j:5 + j, :]
        h = jnp.maximum(h, 0.0)

        # layer 2
        h = jnp.dot(h.astype(jnp.bfloat16), w_ref[o_w2:o_w2 + hp, :],
                    preferred_element_type=jnp.float32)
        h = jnp.maximum(h + b_ref[1:2, :], 0.0)

        # layer 3
        h = jnp.dot(h.astype(jnp.bfloat16), w_ref[o_w3:o_w3 + hp, :],
                    preferred_element_type=jnp.float32)
        h = jnp.maximum(h + b_ref[2:3, :], 0.0)

        # layer 4: q lands in lane 0 of (TB, hp); pack q across lanes via an
        # XLU transpose and store one lane-dense (1, TB) f32 row.
        q = jnp.dot(h.astype(jnp.bfloat16), w_ref[o_w4:o_w4 + hp, :],
                    preferred_element_type=jnp.float32)         # (TB, hp)
        q = q + b_ref[3:4, :]
        out_ref[...] = jnp.transpose(q)[0:1, :].astype(out_ref.dtype)

    return kernel


def _choose_batch_tile(B, batch_tile):
    """Lane-dense (multiple-of-128) batch tile, aiming for >=2 grid steps."""
    batch_tile = max(128, _round_up(batch_tile, 128))
    half = _round_up(max((B + 1) // 2, 1), 128)    # >=2 steps when B > 128
    return min(batch_tile, half)


def critic_forward(state, action, w_packed, b_packed, *, batch_tile=2048):
    """state: (B, state_dim), action: (B, action_dim) -> q: (B, 1)."""
    B, state_dim = state.shape
    _, action_dim = action.shape
    hp = w_packed.shape[1]                         # 128-padded hidden width
    sp = _round_up(state_dim, 16)
    assert w_packed.shape[0] == sp + 3 * hp, w_packed.shape
    assert b_packed.shape[1] == hp and b_packed.shape[0] >= 4 + action_dim

    tb = _choose_batch_tile(B, batch_tile)
    num_tiles = pl.cdiv(B, tb)

    kernel = _make_critic_kernel(state_dim, action_dim, hp)

    flops = 2 * B * (state_dim + action_dim + 3 * hp) * hp
    bytes_accessed = (B * (state_dim + action_dim) * 4      # inputs (f32)
                      + num_tiles * tb * 4                   # packed q rows
                      + w_packed.size * 2 + b_packed.size * 4)

    q_rows = pl.pallas_call(
        kernel,
        out_shape=jax.ShapeDtypeStruct((num_tiles, 1, tb), jnp.float32),
        grid=(num_tiles,),
        in_specs=[
            pl.BlockSpec((tb, state_dim), lambda i: (i, 0)),    # pipelined
            pl.BlockSpec((tb, action_dim), lambda i: (i, 0)),   # pipelined
            pl.BlockSpec(w_packed.shape, lambda i: (0, 0)),     # VMEM-resident
            pl.BlockSpec(b_packed.shape, lambda i: (0, 0)),     # VMEM-resident
        ],
        out_specs=pl.BlockSpec((None, 1, tb), lambda i: (i, 0, 0)),  # (1, TB)
        compiler_params=pltpu.CompilerParams(
            dimension_semantics=("parallel",)),
        cost_estimate=pl.CostEstimate(flops=flops, transcendentals=0,
                                      bytes_accessed=bytes_accessed),
    )(state, action, w_packed, b_packed)

    # Flat reshape is free; padded lanes (rows >= B) are sliced off.
    return q_rows.reshape(-1)[:B].reshape(B, 1)


def init_critic_params(key, state_dim, action_dim, layer_height=100):
    """PyTorch-style uniform(+-1/sqrt(fan_in)) init; weights stored (in, out)."""
    dims = [(state_dim + action_dim, layer_height),
            (layer_height, layer_height),
            (layer_height, layer_height),
            (layer_height, 1)]
    params = []
    for fan_in, fan_out in dims:
        key, kw, kb = jax.random.split(key, 3)
        bound = 1.0 / float(fan_in) ** 0.5
        w = jax.random.uniform(kw, (fan_in, fan_out), jnp.float32, -bound, bound)
        b = jax.random.uniform(kb, (fan_out,), jnp.float32, -bound, bound)
        params.append((w, b))
    return params


def pack_critic_params(params, state_dim, action_dim, *, lane=128):
    """Pack layers into one bf16 weight slab + one f32 bias/aux slab.

    Weight slab rows: [W1_state | W2 | W3 | W4]; every segment is zero-padded
    to 128 lanes (hidden 100 -> 128) and 16-aligned rows.  W4 is folded into a
    (hp, hp) block whose only non-zero column is column 0.
    Bias slab rows: [b1, b2, b3, b4, W1_action rows..., zero pad] (f32) - the
    tiny action contraction runs on the VPU against these f32 rows.
    All padding is exact zeros, so it never leaks into q (zero * anything,
    ReLU(0) = 0, zero bias lanes).
    """
    (w1, b1), (w2, b2), (w3, b3), (w4, b4) = params
    H = w2.shape[0]
    hp = _round_up(H, lane)
    sp = _round_up(state_dim, 16)

    def pad2(w, rows, cols):
        return jnp.pad(w, ((0, rows - w.shape[0]), (0, cols - w.shape[1])))

    w1s = pad2(w1[:state_dim], sp, hp)
    w2p = pad2(w2, hp, hp)
    w3p = pad2(w3, hp, hp)
    w4p = pad2(w4, hp, hp)          # only column 0 is real
    w_packed = jnp.concatenate([w1s, w2p, w3p, w4p],
                               axis=0).astype(jnp.bfloat16)

    def pad_row(v):
        return jnp.pad(v, (0, hp - v.shape[0]))

    rows = [pad_row(b1), pad_row(b2), pad_row(b3), pad_row(b4)]
    rows += [pad_row(w1[state_dim + j]) for j in range(action_dim)]  # W1_action
    n_rows = _round_up(len(rows), 8)
    rows += [jnp.zeros((hp,), jnp.float32)] * (n_rows - len(rows))
    b_packed = jnp.stack(rows, axis=0).astype(jnp.float32)           # (8k, hp)
    return w_packed, b_packed


def critic_reference(state, action, params, *, mirror_kernel=True):
    """Pure-JAX reference of Critic.forward (deep branch).

    mirror_kernel=True reproduces the kernel's numerics (bf16 weights /
    activations with f32 accumulation, f32 action path); False is the exact
    f32 PyTorch-equivalent forward.
    """
    (w1, b1), (w2, b2), (w3, b3), (w4, b4) = params
    sd = state.shape[1]
    if mirror_kernel:
        def mm(x, w):
            return jnp.dot(x.astype(jnp.bfloat16), w.astype(jnp.bfloat16),
                           preferred_element_type=jnp.float32)
        h = jnp.maximum(mm(state, w1[:sd]) + jnp.dot(action, w1[sd:]) + b1, 0.0)
        h = jnp.maximum(mm(h, w2) + b2, 0.0)
        h = jnp.maximum(mm(h, w3) + b3, 0.0)
        return mm(h, w4) + b4
    x = jnp.concatenate([state, action], axis=1)
    h = jnp.maximum(jnp.dot(x, w1) + b1, 0.0)
    h = jnp.maximum(jnp.dot(h, w2) + b2, 0.0)
    h = jnp.maximum(jnp.dot(h, w3) + b3, 0.0)
    return jnp.dot(h, w4) + b4


if __name__ == "__main__":
    state_dim = 24
    action_dim = 2
    layer_height = 100

    key = jax.random.PRNGKey(0)
    kp, ks, ka, ks2, ka2 = jax.random.split(key, 5)

    params = init_critic_params(kp, state_dim, action_dim, layer_height)
    w_packed, b_packed = pack_critic_params(params, state_dim, action_dim)

    # --- small batch (single grid step, oversize/partial block path) ---
    batch = 2
    state = jax.random.normal(ks, (batch, state_dim), jnp.float32)
    action = jax.random.normal(ka, (batch, action_dim), jnp.float32)
    q = jax.block_until_ready(critic_forward(state, action, w_packed, b_packed))
    assert q.shape == (batch, 1), q.shape
    q_ref = critic_reference(state, action, params, mirror_kernel=True)
    assert jnp.allclose(q, q_ref, atol=1e-3, rtol=1e-2), (q, q_ref)
    q_f32 = critic_reference(state, action, params, mirror_kernel=False)
    assert jnp.allclose(q, q_f32, atol=5e-2, rtol=5e-2), (q, q_f32)

    # --- ragged multi-tile batch (>=2 grid steps, partial last block,
    #     lane-packed output rows) ---
    batch2 = 300
    state2 = jax.random.normal(ks2, (batch2, state_dim), jnp.float32)
    action2 = jax.random.normal(ka2, (batch2, action_dim), jnp.float32)
    q2 = jax.block_until_ready(
        critic_forward(state2, action2, w_packed, b_packed, batch_tile=256))
    assert q2.shape == (batch2, 1), q2.shape
    q2_ref = critic_reference(state2, action2, params, mirror_kernel=True)
    assert jnp.allclose(q2, q2_ref, atol=1e-3, rtol=1e-2)
    q2_f32 = critic_reference(state2, action2, params, mirror_kernel=False)
    assert jnp.allclose(q2, q2_f32, atol=5e-2, rtol=5e-2)

    print("KERNEL_OK")
</pallas_src>

<mosaic_0001>
module attributes {stable_mosaic.version = 11 : i64} {
  func.func @kernel(%arg0: i32, %arg1: memref<128x24xf32, #tpu.memory_space<vmem>>, %arg2: memref<128x2xf32, #tpu.memory_space<vmem>>, %arg3: memref<416x128xbf16, #tpu.memory_space<vmem>>, %arg4: memref<8x128xf32, #tpu.memory_space<vmem>>, %arg5: memref<1x1x128xf32, #tpu.memory_space<vmem>>) attributes {dimension_semantics = [#tpu.dimension_semantics<parallel>], iteration_bounds = array<i64: 1>, scalar_prefetch = 0 : i64, scratch_operands = 0 : i64, tpu.core_type = #tpu.core_type<tc>, window_params = [{transform_indices = @transform_0, window_bounds = array<i64: 128, 24>}, {transform_indices = @transform_1, window_bounds = array<i64: 128, 2>}, {pipeline_mode = #tpu.pipeline_mode<synchronous>, transform_indices = @transform_2, window_bounds = array<i64: 416, 128>}, {pipeline_mode = #tpu.pipeline_mode<synchronous>, transform_indices = @transform_3, window_bounds = array<i64: 8, 128>}, {transform_indices = @transform_4, window_bounds = array<i64: 1, 1, 128>}]} {
    %c0 = arith.constant 0 : index
    %c0_0 = arith.constant 0 : index
    %0 = vector.load %arg1[%c0, %c0_0] : memref<128x24xf32, #tpu.memory_space<vmem>>, vector<128x24xf32>
    %1 = arith.truncf %0 : vector<128x24xf32> to vector<128x24xbf16>
    %c0_1 = arith.constant 0 : index
    %c0_2 = arith.constant 0 : index
    %2 = vector.load %arg3[%c0_1, %c0_2] : memref<416x128xbf16, #tpu.memory_space<vmem>>, vector<24x128xbf16>
    %cst = arith.constant dense<0.000000e+00> : vector<128x128xf32>
    %3 = tpu.matmul %1, %2, %cst {dimension_numbers = #tpu.dot_dimension_numbers<[1], [0], [0], [1], [0, 0, 1, 1], [], []>} : vector<128x24xbf16>, vector<24x128xbf16>, vector<128x128xf32> -> vector<128x128xf32>
    %c0_3 = arith.constant 0 : index
    %c0_4 = arith.constant 0 : index
    %4 = vector.load %arg4[%c0_3, %c0_4] : memref<8x128xf32, #tpu.memory_space<vmem>>, vector<1x128xf32>
    %5 = vector.broadcast %4 : vector<1x128xf32> to vector<128x128xf32>
    %6 = arith.addf %3, %5 : vector<128x128xf32>
    %c0_5 = arith.constant 0 : index
    %c0_6 = arith.constant 0 : index
    %7 = vector.load %arg2[%c0_5, %c0_6] : memref<128x2xf32, #tpu.memory_space<vmem>>, vector<128x1xf32>
    %c4 = arith.constant 4 : index
    %c0_7 = arith.constant 0 : index
    %8 = vector.load %arg4[%c4, %c0_7] : memref<8x128xf32, #tpu.memory_space<vmem>>, vector<1x128xf32>
    %9 = vector.broadcast %7 : vector<128x1xf32> to vector<128x128xf32>
    %10 = vector.broadcast %8 : vector<1x128xf32> to vector<128x128xf32>
    %11 = arith.mulf %9, %10 : vector<128x128xf32>
    %12 = arith.addf %6, %11 : vector<128x128xf32>
    %c0_8 = arith.constant 0 : index
    %c1 = arith.constant 1 : index
    %13 = vector.load %arg2[%c0_8, %c1] : memref<128x2xf32, #tpu.memory_space<vmem>>, vector<128x1xf32>
    %c5 = arith.constant 5 : index
    %c0_9 = arith.constant 0 : index
    %14 = vector.load %arg4[%c5, %c0_9] : memref<8x128xf32, #tpu.memory_space<vmem>>, vector<1x128xf32>
    %15 = vector.broadcast %13 : vector<128x1xf32> to vector<128x128xf32>
    %16 = vector.broadcast %14 : vector<1x128xf32> to vector<128x128xf32>
    %17 = arith.mulf %15, %16 : vector<128x128xf32>
    %18 = arith.addf %12, %17 : vector<128x128xf32>
    %cst_10 = arith.constant 0.000000e+00 : f32
    %19 = vector.broadcast %cst_10 : f32 to vector<128x128xf32>
    %20 = arith.maximumf %18, %19 : vector<128x128xf32>
    %21 = arith.truncf %20 : vector<128x128xf32> to vector<128x128xbf16>
    %c32 = arith.constant 32 : index
    %c0_11 = arith.constant 0 : index
    %22 = vector.load %arg3[%c32, %c0_11] : memref<416x128xbf16, #tpu.memory_space<vmem>>, vector<128x128xbf16>
    %cst_12 = arith.constant dense<0.000000e+00> : vector<128x128xf32>
    %23 = tpu.matmul %21, %22, %cst_12 {dimension_numbers = #tpu.dot_dimension_numbers<[1], [0], [0], [1], [0, 0, 1, 1], [], []>} : vector<128x128xbf16>, vector<128x128xbf16>, vector<128x128xf32> -> vector<128x128xf32>
    %c1_13 = arith.constant 1 : index
    %c0_14 = arith.constant 0 : index
    %24 = vector.load %arg4[%c1_13, %c0_14] : memref<8x128xf32, #tpu.memory_space<vmem>>, vector<1x128xf32>
    %25 = vector.broadcast %24 : vector<1x128xf32> to vector<128x128xf32>
    %26 = arith.addf %23, %25 : vector<128x128xf32>
    %cst_15 = arith.constant 0.000000e+00 : f32
    %27 = vector.broadcast %cst_15 : f32 to vector<128x128xf32>
    %28 = arith.maximumf %26, %27 : vector<128x128xf32>
    %29 = arith.truncf %28 : vector<128x128xf32> to vector<128x128xbf16>
    %c160 = arith.constant 160 : index
    %c0_16 = arith.constant 0 : index
    %30 = vector.load %arg3[%c160, %c0_16] : memref<416x128xbf16, #tpu.memory_space<vmem>>, vector<128x128xbf16>
    %cst_17 = arith.constant dense<0.000000e+00> : vector<128x128xf32>
    %31 = tpu.matmul %29, %30, %cst_17 {dimension_numbers = #tpu.dot_dimension_numbers<[1], [0], [0], [1], [0, 0, 1, 1], [], []>} : vector<128x128xbf16>, vector<128x128xbf16>, vector<128x128xf32> -> vector<128x128xf32>
    %c2 = arith.constant 2 : index
    %c0_18 = arith.constant 0 : index
    %32 = vector.load %arg4[%c2, %c0_18] : memref<8x128xf32, #tpu.memory_space<vmem>>, vector<1x128xf32>
    %33 = vector.broadcast %32 : vector<1x128xf32> to vector<128x128xf32>
    %34 = arith.addf %31, %33 : vector<128x128xf32>
    %cst_19 = arith.constant 0.000000e+00 : f32
    %35 = vector.broadcast %cst_19 : f32 to vector<128x128xf32>
    %36 = arith.maximumf %34, %35 : vector<128x128xf32>
    %37 = arith.truncf %36 : vector<128x128xf32> to vector<128x128xbf16>
    %c288 = arith.constant 288 : index
    %c0_20 = arith.constant 0 : index
    %38 = vector.load %arg3[%c288, %c0_20] : memref<416x128xbf16, #tpu.memory_space<vmem>>, vector<128x128xbf16>
    %cst_21 = arith.constant dense<0.000000e+00> : vector<128x128xf32>
    %39 = tpu.matmul %37, %38, %cst_21 {dimension_numbers = #tpu.dot_dimension_numbers<[1], [0], [0], [1], [0, 0, 1, 1], [], []>} : vector<128x128xbf16>, vector<128x128xbf16>, vector<128x128xf32> -> vector<128x128xf32>
    %c3 = arith.constant 3 : index
    %c0_22 = arith.constant 0 : index
    %40 = vector.load %arg4[%c3, %c0_22] : memref<8x128xf32, #tpu.memory_space<vmem>>, vector<1x128xf32>
    %41 = vector.broadcast %40 : vector<1x128xf32> to vector<128x128xf32>
    %42 = arith.addf %39, %41 : vector<128x128xf32>
    %43 = tpu.transpose %42, [1, 0] : vector<128x128xf32> -> vector<128x128xf32>
    %44 = vector.extract_strided_slice %43 {offsets = [0, 0], sizes = [1, 128], strides = [1, 1]} : vector<128x128xf32> to vector<1x128xf32>
    %c0_23 = arith.constant 0 : index
    %c0_24 = arith.constant 0 : index
    %c0_25 = arith.constant 0 : index
    %45 = vector.load %arg5[%c0_23, %c0_24, %c0_25] : memref<1x1x128xf32, #tpu.memory_space<vmem>>, vector<1x1x128xf32>
    %46 = vector.shape_cast %45 : vector<1x1x128xf32> to vector<1x128xf32>
    %47 = vector.shape_cast %44 : vector<1x128xf32> to vector<1x1x128xf32>
    tpu.vector_store %arg5[%c0_23, %c0_24, %c0_25], %47 {strides = array<i32>} : memref<1x1x128xf32, #tpu.memory_space<vmem>>, vector<1x1x128xf32>,
    return
  }
  func.func @transform_0(%arg0: i32) -> (i32, i32) {
    %c0_i32 = arith.constant 0 : i32
    %c0_i32_0 = arith.constant 0 : i32
    return %arg0, %c0_i32 : i32, i32
  }
  func.func @transform_1(%arg0: i32) -> (i32, i32) {
    %c0_i32 = arith.constant 0 : i32
    %c0_i32_0 = arith.constant 0 : i32
    return %arg0, %c0_i32 : i32, i32
  }
  func.func @transform_2(%arg0: i32) -> (i32, i32) {
    %c0_i32 = arith.constant 0 : i32
    %c0_i32_0 = arith.constant 0 : i32
    %c0_i32_1 = arith.constant 0 : i32
    return %c0_i32, %c0_i32_0 : i32, i32
  }
  func.func @transform_3(%arg0: i32) -> (i32, i32) {
    %c0_i32 = arith.constant 0 : i32
    %c0_i32_0 = arith.constant 0 : i32
    %c0_i32_1 = arith.constant 0 : i32
    return %c0_i32, %c0_i32_0 : i32, i32
  }
  func.func @transform_4(%arg0: i32) -> (i32, i32, i32) {
    %c0_i32 = arith.constant 0 : i32
    %c0_i32_0 = arith.constant 0 : i32
    %c0_i32_1 = arith.constant 0 : i32
    return %arg0, %c0_i32, %c0_i32_0 : i32, i32, i32
  }
}

</mosaic_0001>

<bundles_post_ra>
// kernel: tpu_custom_call.1
= control target key start
LH: loop header
LB: loop body
LE: loop exit
PB: predicated region body
PF: predicated region fallthrough
CT: control target
= control target key end

     0   :  { %9 = vsyncpa [#allocation3], 0  ;;  %s1338_s0 = inlined_call_operand.hbm [shape: f32[2,24], index: 0, kind: input, shape index: {}]   ;;  %s1339_s1 = inlined_call_operand.hbm [shape: f32[2,2], index: 1, kind: input, shape index: {}]   ;;  %s1340_s2 = inlined_call_operand.hbm [shape: bf16[416,128], index: 2, kind: input, shape index: {}]   ;;  %s1341_s3 = inlined_call_operand.hbm [shape: f32[8,128], index: 3, kind: input, shape index: {}]   ;;  %s1342_s4 = inlined_call_operand.hbm [shape: f32[1,1,128], index: 4, kind: output, shape index: {}]  }
   0x1   :  { %10 = vsyncpa [#allocation6], 0 }
   0x2   :  { %11 = vsyncpa [#allocation9], 0 }
   0x3   :  { %12 = vsyncpa [#allocation4], 0 }
   0x4   :  { %16 = vsyncadd [#allocation3], 2016  ;;  %s17_s17 = sshll.u32 %s1338_s0, 4  ;;  %s1189_s18 = smov [#allocation2]   ;;  %s18_s17 = int_to_ptr.hbm [resolvable:$true] %s17_s17 }
   0x5   :  { %s19_s19 = sshll.u32 %s1189_s18, 4  ;;  %s1190_s20 = smov 32   ;;  %s20_s19 = int_to_ptr.vmem [resolvable:$true] %s19_s19 }
   0x6   :  { %s1191_s21 = smov 2  }
   0x7   :  { %25 = dma.hbm_to_vmem [thread:$0]  %s18_s17, 32, %s20_s19, [#allocation3], %s1190_s20, %s1190_s20, %s1191_s21  }
   0x8   :  { %29 = vsyncadd [#allocation6], 2016  ;;  %s30_s24 = sshll.u32 %s1339_s1, 4  ;;  %s1192_s25 = smov [#allocation5]   ;;  %s31_s24 = int_to_ptr.hbm [resolvable:$true] %s30_s24 }
   0x9   :  { %s32_s26 = sshll.u32 %s1192_s25, 4  ;;  %s43_s0 = sshll.u32 %s1340_s2, 4  ;;  %s33_s26 = int_to_ptr.vmem [resolvable:$true] %s32_s26  ;;  %s44_s0 = int_to_ptr.hbm [resolvable:$true] %s43_s0 }
   0xa   :  { %38 = dma.hbm_to_vmem [thread:$0]  %s31_s24, 32, %s33_s26, [#allocation6], %s1190_s20, %s1190_s20, %s1191_s21  }
   0xb   :  { %s1193_s29 = smov [#allocation7]   ;;  %s1194_s5 = smov 64  }
   0xc   :  { %s45_s30 = sshll.u32 %s1193_s29, 4  ;;  %s1195_s6 = smov 4   ;;  %s46_s30 = int_to_ptr.vmem [resolvable:$true] %s45_s30 }
   0xd   :  { %51 = dma.hbm_to_vmem [thread:$0]  %s44_s0, 3328, %s46_s30, [#allocation6], %s1194_s5, %s1194_s5, %s1195_s6  }
   0xe   :  { %s57_s1 = sshll.u32 %s1341_s3, 4  ;;  %s1196_s9 = smov [#allocation8]   ;;  %s58_s1 = int_to_ptr.hbm [resolvable:$true] %s57_s1 }
   0xf   :  { %s59_s10 = sshll.u32 %s1196_s9, 4  ;;  %s60_s10 = int_to_ptr.vmem [resolvable:$true] %s59_s10 }
  0x10   :  { %62 = dma.hbm_to_vmem [thread:$0]  %s58_s1, 128, %s60_s10, [#allocation9]  }
  0x11   :  { %1181 = dma.done.wait [#allocation3], 2048  }
  0x12   :  { %1182 = vsyncadd [#allocation3], 4294965248 }
  0x13   :  { %1183 = dma.done.wait [#allocation6], 5376  }
  0x14   :  { %1184 = vsyncadd [#allocation6], 4294961920 }
  0x15   :  { %1185 = dma.done.wait [#allocation9], 128  }
  0x16   :  { %1186 = vsyncadd [#allocation9], 4294967168  ;;  %v1197_v0 = vmov 1   ;;  %v1198_v1 = vmov 0   ;;  %v106_v2 = vld [vmem:[#allocation7 + $0x8] sm:$0xf] }
  0x17   :  { %1038 = vset.pattern.permute.xlu1 %v1197_v0  ;;  %1037 = vset.pattern.permute.xlu0 %v1198_v1  ;;  %v196_v3 = vld [vmem:[#allocation5] sm:$0xff]  ;;  %v114_v4 = vunpack.c.l.b16 %v106_v2  ;;  %vm143_vm0 = vcmask 1043456   ;;  %v198_v6 = vld [vmem:[#allocation5 + $0x10] sm:$0xff]  ;;  %v81_v10 = vld [vmem:[#allocation2 + $0x8] sm:$0xff]  ;;  %vm118_vm1 = vcmask 195584   ;;  %s1199_s2 = smov [#allocation10]  }
  0x18   :  { %1039 = vset.pattern.permute.xlu2 %v1198_v1  ;;  %328 = vperm.xlu1 %1038, %v196_v3   ;;  %v1001_v7 = vld [vmem:[#allocation7] sm:$0xff]  ;;  %v197_v11 = vld [vmem:[#allocation5 + $0x8] sm:$0xff]  ;;  %v199_v13 = vld [vmem:[#allocation5 + $0x18] sm:$0xff]  ;;  %s879_s3 = sshll.u32 %s1199_s2, 4  ;;  %s881_s13 = sshll.u32 %s1342_s4, 4  ;;  %s880_s3 = int_to_ptr.vmem [resolvable:$true] %s879_s3  ;;  %s882_s13 = int_to_ptr.hbm [resolvable:$true] %s881_s13 }
  0x19   :  { %215 = vperm.xlu0 %1037, %v196_v3   ;;  %v116_v5 = vpack.c.b16 %v114_v4, %v114_v4  ;;  %v80_v8 = vld [vmem:[#allocation2] sm:$0xff]  ;;  %225 = vperm.xlu2 %1039, %v198_v6   ;;  %v82_v14 = vld [vmem:[#allocation2 + $0x10] sm:$0xff]  ;;  %v83_v15 = vld [vmem:[#allocation2 + $0x18] sm:$0xff] }
  0x1a   :  { %v96_v12 = vpack.c.bf16 %v81_v10, %v80_v8  ;;  %v201_v16 = vld [vmem:[#allocation5 + $0x28] sm:$0xff]  ;;  %v97_v17 = vpack.c.bf16 %v83_v15, %v82_v14  ;;  %v200_v18 = vld [vmem:[#allocation5 + $0x20] sm:$0xff]  ;;  %v202_v19 = vld [vmem:[#allocation5 + $0x30] sm:$0xff] }
  0x1b   :  { %v145_v9 = vsel %vm143_vm0, %v116_v5, 0  ;;  %v84_v20 = vld [vmem:[#allocation2 + $0x20] sm:$0xff]  ;;  %v85_v21 = vld [vmem:[#allocation2 + $0x28] sm:$0xff]  ;;  %v203_v22 = vld [vmem:[#allocation5 + $0x38] sm:$0xff] }
  0x1c   :  { %153 = vmatpush.bf16.msra.mxu0 %v145_v9  ;;  %v98_v23 = vpack.c.bf16 %v85_v21, %v84_v20  ;;  %v205_v24 = vld [vmem:[#allocation5 + $0x48] sm:$0xff]  ;;  %v204_v25 = vld [vmem:[#allocation5 + $0x40] sm:$0xff]  ;;  %v86_v26 = vld [vmem:[#allocation2 + $0x30] sm:$0xff] }
  0x1d   :  { %v87_v27 = vld [vmem:[#allocation2 + $0x38] sm:$0xff]  ;;  %v206_v29 = vld [vmem:[#allocation5 + $0x50] sm:$0xff]  ;;  %v209_v30 = vld [vmem:[#allocation5 + $0x68] sm:$0xff] }
  0x1e   :  { %v99_v28 = vpack.c.bf16 %v87_v27, %v86_v26  ;;  %v88_v31 = vld [vmem:[#allocation2 + $0x40] sm:$0xff]  ;;  %v89_v32 = vld [vmem:[#allocation2 + $0x48] sm:$0xff]  ;;  %v207_v34 = vld [vmem:[#allocation5 + $0x58] sm:$0xff] }
  0x1f   :  { %v100_v33 = vpack.c.bf16 %v89_v32, %v88_v31  ;;  %v210_v35 = vld [vmem:[#allocation5 + $0x70] sm:$0xff]  ;;  %v91_v37 = vld [vmem:[#allocation2 + $0x58] sm:$0xff]  ;;  %v1009_v39 = vld [vmem:[#allocation7 + $0x48] sm:$0xff] }
  0x20   :  { %332 = vperm.xlu1 %1038, %v197_v11   ;;  %154 = vmatpush.bf16.msra.mxu0 %v1001_v7  ;;  %v90_v36 = vld [vmem:[#allocation2 + $0x50] sm:$0xff]  ;;  %v1008_v40 = vld [vmem:[#allocation7 + $0x40] sm:$0xff]  ;;  %v1007_v42 = vld [vmem:[#allocation7 + $0x38] sm:$0xff] }
  0x21   :  { %220 = vperm.xlu0 %1037, %v197_v11   ;;  %230 = vperm.xlu2 %1039, %v199_v13   ;;  %v101_v38 = vpack.c.bf16 %v91_v37, %v90_v36  ;;  %v208_v41 = vld [vmem:[#allocation5 + $0x60] sm:$0xff]  ;;  %v93_v44 = vld [vmem:[#allocation2 + $0x68] sm:$0xff]  ;;  %v1006_v45 = vld [vmem:[#allocation7 + $0x30] sm:$0xff] }
  0x22   :  { %514 = vmatpush.bf16.msra.mxu1 %v1009_v39  ;;  %v92_v43 = vld [vmem:[#allocation2 + $0x60] sm:$0xff]  ;;  %v1005_v47 = vld [vmem:[#allocation7 + $0x28] sm:$0xff]  ;;  %v211_v48 = vld [vmem:[#allocation5 + $0x78] sm:$0xff] }
  0x23   :  { %897 = vmatmul.msk.bf16.vlgmr.msra.gmra.mxu0 %vm118_vm1, %v96_v12  ;;  %v102_v46 = vpack.c.bf16 %v93_v44, %v92_v43  ;;  %v1004_v49 = vld [vmem:[#allocation7 + $0x20] sm:$0xff]  ;;  %v1003_v50 = vld [vmem:[#allocation7 + $0x18] sm:$0xff]  ;;  %v94_v51 = vld [vmem:[#allocation2 + $0x70] sm:$0xff] }
  0x24   :  { %v95_v52 = vld [vmem:[#allocation2 + $0x78] sm:$0xff]  ;;  %v1002_v53 = vld [vmem:[#allocation7 + $0x10] sm:$0xff] }
  0x25   :  { %v103_v54 = vpack.c.bf16 %v95_v52, %v94_v51  ;;  %v1263_v56 = vld [vmem:[#allocation8 + $0x4] ss:$0 sm:$0xff]  ;;  %v1265_v57 = vld [vmem:[#allocation8] ss:$0 sm:$0xff]  ;;  %v1267_v60 = vld [vmem:[#allocation8 + $0x5] ss:$0 sm:$0xff] }
  0x26   :  { %515 = vmatpush.bf16.msra.mxu1 %v1008_v40 }
  0x28   :  { %340 = vperm.xlu1 %1038, %v199_v13  }
  0x29   :  { %1040 = vset.pattern.permute.xlu0 %v1197_v0  ;;  %235 = vperm.xlu2 %1039, %v200_v18  }
  0x2a   :  { %336 = vperm.xlu0 %1040, %v198_v6   ;;  %516 = vmatpush.bf16.msra.mxu1 %v1007_v42 }
  0x2e   :  { %517 = vmatpush.bf16.msra.mxu1 %v1006_v45 }
  0x30   :  { %1041 = vset.pattern.permute.xlu1 %v1198_v1 }
  0x31   :  { %240 = vperm.xlu1 %1041, %v201_v16   ;;  %1042 = vset.pattern.permute.xlu2 %v1197_v0 }
  0x32   :  { %348 = vperm.xlu0 %1040, %v201_v16   ;;  %344 = vperm.xlu2 %1042, %v200_v18  }
  0x33   :  { %898 = vmatmul.msk.bf16.gmra.mxu0 %vm118_vm1, %v97_v17  ;;  %518 = vmatpush.bf16.msra.mxu1 %v1005_v47 }
  0x37   :  { %519 = vmatpush.bf16.msra.mxu1 %v1004_v49 }
  0x39   :  { %245 = vperm.xlu1 %1041, %v202_v19  }
  0x3a   :  { %352 = vperm.xlu0 %1040, %v202_v19   ;;  %1043 = vset.pattern.permute.xlu2 %v1198_v1 }
  0x3b   :  { %250 = vperm.xlu2 %1043, %v203_v22   ;;  %520 = vmatpush.bf16.msra.mxu1 %v1003_v50 }
  0x3f   :  { %521 = vmatpush.bf16.msra.mxu1 %v1002_v53 }
  0x41   :  { %1044 = vset.pattern.permute.xlu1 %v1197_v0 }
  0x42   :  { %1045 = vset.pattern.permute.xlu0 %v1198_v1  ;;  %356 = vperm.xlu1 %1044, %v203_v22  }
  0x43   :  { %899 = vmatmul.msk.bf16.gmra.mxu0 %vm118_vm1, %v98_v23  ;;  %260 = vperm.xlu0 %1045, %v205_v24  }
  0x44   :  { %255 = vperm.xlu2 %1043, %v204_v25  }
  0x4a   :  { %360 = vperm.xlu1 %1044, %v204_v25  }
  0x4b   :  { %1049 = vset.pattern.permute.xlu0 %v1197_v0 }
  0x4c   :  { %368 = vperm.xlu0 %1049, %v206_v29   ;;  %1046 = vset.pattern.permute.xlu2 %v1197_v0 }
  0x4d   :  { %364 = vperm.xlu2 %1046, %v205_v24  }
  0x52   :  { %1047 = vset.pattern.permute.xlu1 %v1198_v1 }
  0x53   :  { %900 = vmatmul.msk.bf16.gmra.mxu0 %vm118_vm1, %v99_v28  ;;  %265 = vperm.xlu1 %1047, %v206_v29  }
  0x54   :  { %380 = vperm.xlu0 %1049, %v209_v30  }
  0x55   :  { %1048 = vset.pattern.permute.xlu2 %v1198_v1 }
  0x56   :  { %270 = vperm.xlu2 %1048, %v207_v34  }
  0x5b   :  { %1050 = vset.pattern.permute.xlu1 %v1197_v0 }
  0x5c   :  { %372 = vperm.xlu1 %1050, %v207_v34   ;;  %384 = vperm.xlu0 %1049, %v210_v35  }
  0x5e   :  { %275 = vperm.xlu2 %1048, %v208_v41  }
  0x63   :  { %901 = vmatmul.msk.bf16.gmra.mxu0 %vm118_vm1, %v100_v33 }
  0x64   :  { %1051 = vset.pattern.permute.xlu1 %v1198_v1 }
  0x65   :  { %280 = vperm.xlu1 %1051, %v209_v30  }
  0x66   :  { %1052 = vset.pattern.permute.xlu2 %v1197_v0 }
  0x67   :  { %376 = vperm.xlu2 %1052, %v208_v41  }
  0x6d   :  { %285 = vperm.xlu1 %1051, %v210_v35  }
  0x6f   :  { %1053 = vset.pattern.permute.xlu2 %v1198_v1 }
  0x70   :  { %290 = vperm.xlu2 %1053, %v211_v48  }
  0x73   :  { %902 = vmatmul.msk.bf16.gmra.mxu0 %vm118_vm1, %v101_v38  ;;  %v226_v2 = vpop.permute.xlu2 %225 }
  0x74   :  { %v296_v16 = vmul.f32 %v1263_v56, %v226_v2 }
  0x75   :  { %1054 = vset.pattern.permute.xlu1 %v1197_v0 }
  0x76   :  { %388 = vperm.xlu1 %1054, %v211_v48  }
  0x7b   :  { %v231_v15 = vpop.permute.xlu2 %230 }
  0x7c   :  { %v297_v23 = vmul.f32 %v1263_v56, %v231_v15 }
  0x83   :  { %903 = vmatmul.msk.bf16.gmra.mxu0 %vm118_vm1, %v102_v46  ;;  %v236_v28 = vpop.permute.xlu2 %235 }
  0x84   :  { %v298_v36 = vmul.f32 %v1263_v56, %v236_v28 }
  0x8a   :  { %v329_v58 = vpop.permute.xlu1 %328 }
  0x8b   :  { %v216_v55 = vpop.permute.xlu0 %215  ;;  %v392_v0 = vmul.f32 %v1267_v60, %v329_v58 }
  0x8c   :  { %v294_v61 = vmul.f32 %v1263_v56, %v216_v55  ;;  %v345_v35 = vpop.permute.xlu2 %344 }
  0x8d   :  { %v396_v40 = vmul.f32 %v1267_v60, %v345_v35 }
  0x92   :  { %v333_v6 = vpop.permute.xlu1 %332 }
  0x93   :  { %904 = vmatmul.msk.bf16.gmra.mxu0 %vm118_vm1, %v103_v54  ;;  %v221_v63 = vpop.permute.xlu0 %220  ;;  %v393_v7 = vmul.f32 %v1267_v60, %v333_v6 }
  0x94   :  { %v295_v4 = vmul.f32 %v1263_v56, %v221_v63 }
  0x95   :  { %v251_v58 = vpop.permute.xlu2 %250 }
  0x9a   :  { %v341_v21 = vpop.permute.xlu1 %340 }
  0x9b   :  { %v395_v25 = vmul.f32 %v1267_v60, %v341_v21 }
  0x9c   :  { %v337_v18 = vpop.permute.xlu0 %336 }
  0x9d   :  { %v394_v19 = vmul.f32 %v1267_v60, %v337_v18 }
  0xa0   :  { %v156_v59 = vpop.f32.mrf.mxu0 }
  0xa1   :  { %v157_v62 = vadd.f32 %v1265_v57, %v156_v59  ;;  %v301_v59 = vmul.f32 %v1263_v56, %v251_v58 }
  0xa3   :  { %v310_v1 = vadd.f32 %v294_v61, %v157_v62  ;;  %v241_v37 = vpop.permute.xlu1 %240 }
  0xa4   :  { %v299_v38 = vmul.f32 %v1263_v56, %v241_v37  ;;  %v349_v43 = vpop.permute.xlu0 %348 }
  0xa5   :  { %v408_v9 = vadd.f32 %v392_v0, %v310_v1  ;;  %v397_v44 = vmul.f32 %v1267_v60, %v349_v43 }
  0xa7   :  { %v424_v11 = vmax.f32 %v408_v9, 0.0 }
  0xa8   :  { %v158_v3 = vpop.f32.mrf.mxu0 }
  0xa9   :  { %v159_v5 = vadd.f32 %v1265_v57, %v158_v3 }
  0xab   :  { %v311_v8 = vadd.f32 %v295_v4, %v159_v5  ;;  %v246_v50 = vpop.permute.xlu1 %245 }
  0xac   :  { %v300_v54 = vmul.f32 %v1263_v56, %v246_v50  ;;  %v353_v55 = vpop.permute.xlu0 %352  ;;  %v1016_v50 = vld [vmem:[#allocation7 + $0x80] sm:$0xff] }
  0xad   :  { %v409_v10 = vadd.f32 %v393_v7, %v311_v8  ;;  %v398_v0 = vmul.f32 %v1267_v60, %v353_v55  ;;  %v256_v8 = vpop.permute.xlu2 %255 }
  0xaf   :  { %v425_v12 = vmax.f32 %v409_v10, 0.0 }
  0xb0   :  { %v161_v13 = vpop.f32.mrf.mxu0 }
  0xb1   :  { %v440_v14 = vpack.c.bf16 %v425_v12, %v424_v11  ;;  %v162_v17 = vadd.f32 %v1265_v57, %v161_v13  ;;  %v302_v12 = vmul.f32 %v1263_v56, %v256_v8 }
  0xb3   :  { %522 = vmatmul.bf16.vlgmr.msra.gmra.mxu1 %v440_v14  ;;  %v312_v20 = vadd.f32 %v296_v16, %v162_v17 }
  0xb4   :  { %v357_v62 = vpop.permute.xlu1 %356 }
  0xb5   :  { %v410_v27 = vadd.f32 %v394_v19, %v312_v20  ;;  %v399_v1 = vmul.f32 %v1267_v60, %v357_v62  ;;  %v261_v14 = vpop.permute.xlu0 %260  ;;  %v365_v17 = vpop.permute.xlu2 %364 }
  0xb6   :  { %v303_v16 = vmul.f32 %v1263_v56, %v261_v14  ;;  %v401_v20 = vmul.f32 %v1267_v60, %v365_v17 }
  0xb7   :  { %v426_v30 = vmax.f32 %v410_v27, 0.0 }
  0xb8   :  { %v163_v22 = vpop.f32.mrf.mxu0 }
  0xb9   :  { %v164_v24 = vadd.f32 %v1265_v57, %v163_v22 }
  0xbb   :  { %v313_v26 = vadd.f32 %v297_v23, %v164_v24 }
  0xbc   :  { %v361_v13 = vpop.permute.xlu1 %360 }
  0xbd   :  { %v411_v29 = vadd.f32 %v395_v25, %v313_v26  ;;  %v400_v19 = vmul.f32 %v1267_v60, %v361_v13 }
  0xbf   :  { %v427_v31 = vmax.f32 %v411_v29, 0.0 }
  0xc0   :  { %v166_v32 = vpop.f32.mrf.mxu0 }
  0xc1   :  { %v441_v33 = vpack.c.bf16 %v427_v31, %v426_v30  ;;  %v167_v34 = vadd.f32 %v1265_v57, %v166_v32  ;;  %v271_v30 = vpop.permute.xlu2 %270 }
  0xc2   :  { %v305_v35 = vmul.f32 %v1263_v56, %v271_v30 }
  0xc3   :  { %527 = vmatmul.bf16.gmra.mxu1 %v441_v33  ;;  %v314_v39 = vadd.f32 %v298_v36, %v167_v34  ;;  %v369_v33 = vpop.permute.xlu0 %368 }
  0xc4   :  { %v402_v34 = vmul.f32 %v1267_v60, %v369_v33  ;;  %v1317_v33 = vld [vmem:[#allocation8 + $0x1] ss:$0 sm:$0xff] }
  0xc5   :  { %v412_v45 = vadd.f32 %v396_v40, %v314_v39  ;;  %v266_v25 = vpop.permute.xlu1 %265 }
  0xc6   :  { %v304_v31 = vmul.f32 %v1263_v56, %v266_v25  ;;  %v1010_v25 = vld [vmem:[#allocation7 + $0x50] sm:$0xff] }
  0xc7   :  { %v428_v48 = vmax.f32 %v412_v45, 0.0  ;;  %v1017_v45 = vld [vmem:[#allocation7 + $0x88] sm:$0xff] }
  0xc8   :  { %v168_v41 = vpop.f32.mrf.mxu0  ;;  %653 = vmatpush.bf16.msra.mxu2 %v1017_v45 }
  0xc9   :  { %v169_v42 = vadd.f32 %v1265_v57, %v168_v41  ;;  %v276_v43 = vpop.permute.xlu2 %275 }
  0xca   :  { %v306_v55 = vmul.f32 %v1263_v56, %v276_v43 }
  0xcb   :  { %v315_v46 = vadd.f32 %v299_v38, %v169_v42 }
  0xcc   :  { %654 = vmatpush.bf16.msra.mxu2 %v1016_v50 }
  0xcd   :  { %v413_v47 = vadd.f32 %v397_v44, %v315_v46 }
  0xce   :  { %v373_v37 = vpop.permute.xlu1 %372 }
  0xcf   :  { %v429_v49 = vmax.f32 %v413_v47, 0.0  ;;  %v403_v39 = vmul.f32 %v1267_v60, %v373_v37 }
  0xd0   :  { %v171_v51 = vpop.f32.mrf.mxu0 }
  0xd1   :  { %v442_v52 = vpack.c.bf16 %v429_v49, %v428_v48  ;;  %v172_v53 = vadd.f32 %v1265_v57, %v171_v51 }
  0xd3   :  { %532 = vmatmul.bf16.gmra.mxu1 %v442_v52  ;;  %v316_v61 = vadd.f32 %v300_v54, %v172_v53  ;;  %v377_v53 = vpop.permute.xlu2 %376  ;;  %v1015_v54 = vld [vmem:[#allocation7 + $0x78] sm:$0xff] }
  0xd4   :  { %655 = vmatpush.bf16.msra.mxu2 %v1015_v54 }
  0xd5   :  { %v414_v4 = vadd.f32 %v398_v0, %v316_v61  ;;  %v404_v61 = vmul.f32 %v1267_v60, %v377_v53 }
  0xd7   :  { %v430_v6 = vmax.f32 %v414_v4, 0.0  ;;  %v281_v52 = vpop.permute.xlu1 %280 }
  0xd8   :  { %v173_v63 = vpop.f32.mrf.mxu0  ;;  %v307_v58 = vmul.f32 %v1263_v56, %v281_v52 }
  0xd9   :  { %v174_v2 = vadd.f32 %v1265_v57, %v173_v63  ;;  %v1014_v63 = vld [vmem:[#allocation7 + $0x70] sm:$0xff] }
  0xda   :  { %656 = vmatpush.bf16.msra.mxu2 %v1014_v63 }
  0xdb   :  { %v317_v3 = vadd.f32 %v301_v59, %v174_v2  ;;  %v291_v14 = vpop.permute.xlu2 %290 }
  0xdd   :  { %v415_v5 = vadd.f32 %v399_v1, %v317_v3  ;;  %v381_v1 = vpop.permute.xlu0 %380 }
  0xde   :  { %v405_v2 = vmul.f32 %v1267_v60, %v381_v1 }
  0xdf   :  { %v431_v7 = vmax.f32 %v415_v5, 0.0 }
  0xe0   :  { %v176_v9 = vpop.f32.mrf.mxu0 }
  0xe1   :  { %v443_v10 = vpack.c.bf16 %v431_v7, %v430_v6  ;;  %v177_v11 = vadd.f32 %v1265_v57, %v176_v9  ;;  %v286_v6 = vpop.permute.xlu1 %285  ;;  %v1013_v7 = vld [vmem:[#allocation7 + $0x68] sm:$0xff] }
  0xe2   :  { %657 = vmatpush.bf16.msra.mxu2 %v1013_v7 }
  0xe3   :  { %537 = vmatmul.bf16.gmra.mxu1 %v443_v10  ;;  %v318_v15 = vadd.f32 %v302_v12, %v177_v11  ;;  %v1012_v12 = vld [vmem:[#allocation7 + $0x60] sm:$0xff] }
  0xe5   :  { %v416_v23 = vadd.f32 %v400_v19, %v318_v15  ;;  %v308_v15 = vmul.f32 %v1263_v56, %v286_v6 }
  0xe6   :  { %658 = vmatpush.bf16.msra.mxu2 %v1012_v12 }
  0xe7   :  { %v432_v26 = vmax.f32 %v416_v23, 0.0 }
  0xe8   :  { %v178_v18 = vpop.f32.mrf.mxu0 }
  0xe9   :  { %v179_v21 = vadd.f32 %v1265_v57, %v178_v18  ;;  %v389_v17 = vpop.permute.xlu1 %388  ;;  %v1011_v18 = vld [vmem:[#allocation7 + $0x58] sm:$0xff] }
  0xea   :  { %659 = vmatpush.bf16.msra.mxu2 %v1011_v18  ;;  %v1022_v18 = vld [vmem:[#allocation7 + $0xb0] sm:$0xff] }
  0xeb   :  { %v319_v22 = vadd.f32 %v303_v16, %v179_v21  ;;  %v385_v16 = vpop.permute.xlu0 %384 }
  0xed   :  { %v417_v24 = vadd.f32 %v401_v20, %v319_v22  ;;  %v309_v20 = vmul.f32 %v1263_v56, %v291_v14  ;;  %v406_v22 = vmul.f32 %v1267_v60, %v385_v16  ;;  %v1023_v14 = vld [vmem:[#allocation7 + $0xb8] sm:$0xff] }
  0xee   :  { %660 = vmatpush.bf16.msra.mxu2 %v1010_v25 }
  0xef   :  { %v433_v27 = vmax.f32 %v417_v24, 0.0  ;;  %v407_v24 = vmul.f32 %v1267_v60, %v389_v17 }
  0xf0   :  { %v181_v28 = vpop.f32.mrf.mxu0 }
  0xf1   :  { %v444_v29 = vpack.c.bf16 %v433_v27, %v432_v26  ;;  %v182_v32 = vadd.f32 %v1265_v57, %v181_v28 }
  0xf3   :  { %542 = vmatmul.bf16.gmra.mxu1 %v444_v29  ;;  %v320_v36 = vadd.f32 %v304_v31, %v182_v32 }
  0xf5   :  { %v418_v42 = vadd.f32 %v402_v34, %v320_v36 }
  0xf7   :  { %v434_v46 = vmax.f32 %v418_v42, 0.0 }
  0xf8   :  { %v183_v38 = vpop.f32.mrf.mxu0 }
  0xf9   :  { %v184_v40 = vadd.f32 %v1265_v57, %v183_v38 }
  0xfb   :  { %v321_v41 = vadd.f32 %v305_v35, %v184_v40 }
  0xfd   :  { %v419_v44 = vadd.f32 %v403_v39, %v321_v41 }
  0xff   :  { %v435_v47 = vmax.f32 %v419_v44, 0.0 }
 0x100   :  { %v186_v48 = vpop.f32.mrf.mxu0 }
 0x101   :  { %v445_v49 = vpack.c.bf16 %v435_v47, %v434_v46  ;;  %v187_v51 = vadd.f32 %v1265_v57, %v186_v48 }
 0x103   :  { %547 = vmatmul.bf16.gmra.mxu1 %v445_v49  ;;  %v322_v59 = vadd.f32 %v306_v55, %v187_v51 }
 0x105   :  { %v420_v3 = vadd.f32 %v404_v61, %v322_v59 }
 0x107   :  { %v436_v8 = vmax.f32 %v420_v3, 0.0 }
 0x108   :  { %v188_v62 = vpop.f32.mrf.mxu0 }
 0x109   :  { %v189_v0 = vadd.f32 %v1265_v57, %v188_v62 }
 0x10b   :  { %v323_v4 = vadd.f32 %v307_v58, %v189_v0 }
 0x10d   :  { %v421_v5 = vadd.f32 %v405_v2, %v323_v4 }
 0x10f   :  { %v437_v9 = vmax.f32 %v421_v5, 0.0 }
 0x110   :  { %v191_v10 = vpop.f32.mrf.mxu0 }
 0x111   :  { %v446_v11 = vpack.c.bf16 %v437_v9, %v436_v8  ;;  %v192_v13 = vadd.f32 %v1265_v57, %v191_v10 }
 0x113   :  { %552 = vmatmul.bf16.gmra.mxu1 %v446_v11  ;;  %v324_v19 = vadd.f32 %v308_v15, %v192_v13  ;;  %v1025_v11 = vld [vmem:[#allocation7 + $0xc8] sm:$0xff]  ;;  %v1024_v13 = vld [vmem:[#allocation7 + $0xc0] sm:$0xff] }
 0x114   :  { %792 = vmatpush.bf16.msra.mxu3 %v1025_v11 }
 0x115   :  { %v422_v27 = vadd.f32 %v406_v22, %v324_v19 }
 0x117   :  { %v438_v30 = vmax.f32 %v422_v27, 0.0  ;;  %v1019_v27 = vld [vmem:[#allocation7 + $0x98] sm:$0xff] }
 0x118   :  { %v193_v21 = vpop.f32.mrf.mxu0  ;;  %793 = vmatpush.bf16.msra.mxu3 %v1024_v13 }
 0x119   :  { %v194_v23 = vadd.f32 %v1265_v57, %v193_v21 }
 0x11b   :  { %v325_v26 = vadd.f32 %v309_v20, %v194_v23  ;;  %v1021_v23 = vld [vmem:[#allocation7 + $0xa8] sm:$0xff] }
 0x11c   :  { %794 = vmatpush.bf16.msra.mxu3 %v1023_v14 }
 0x11d   :  { %v423_v28 = vadd.f32 %v407_v24, %v325_v26  ;;  %v1020_v24 = vld [vmem:[#allocation7 + $0xa0] sm:$0xff] }
 0x11f   :  { %v439_v29 = vmax.f32 %v423_v28, 0.0 }
 0x120   :  { %795 = vmatpush.bf16.msra.mxu3 %v1022_v18 }
 0x121   :  { %v447_v31 = vpack.c.bf16 %v439_v29, %v438_v30 }
 0x123   :  { %557 = vmatmul.bf16.gmra.mxu1 %v447_v31  ;;  %v1018_v31 = vld [vmem:[#allocation7 + $0x90] sm:$0xff] }
 0x124   :  { %796 = vmatpush.bf16.msra.mxu3 %v1021_v23 }
 0x128   :  { %797 = vmatpush.bf16.msra.mxu3 %v1020_v24 }
 0x12c   :  { %798 = vmatpush.bf16.msra.mxu3 %v1019_v27 }
 0x130   :  { %v523_v32 = vpop.f32.mrf.mxu1  ;;  %799 = vmatpush.bf16.msra.mxu3 %v1018_v31 }
 0x131   :  { %v524_v56 = vadd.f32 %v1317_v33, %v523_v32 }
 0x133   :  { %v563_v57 = vmax.f32 %v524_v56, 0.0 }
 0x138   :  { %v525_v34 = vpop.f32.mrf.mxu1 }
 0x139   :  { %v526_v35 = vadd.f32 %v1317_v33, %v525_v34  ;;  %v1059_v34 = vld [vmem:[#allocation8 + $0x2] ss:$0 sm:$0xff] }
 0x13b   :  { %v564_v36 = vmax.f32 %v526_v35, 0.0 }
 0x13d   :  { %v579_v60 = vpack.c.bf16 %v564_v36, %v563_v57 }
 0x13f   :  { %661 = vmatmul.bf16.vlgmr.msra.gmra.mxu2 %v579_v60 }
 0x140   :  { %v528_v37 = vpop.f32.mrf.mxu1 }
 0x141   :  { %v529_v38 = vadd.f32 %v1317_v33, %v528_v37 }
 0x143   :  { %v565_v41 = vmax.f32 %v529_v38, 0.0 }
 0x148   :  { %v530_v39 = vpop.f32.mrf.mxu1 }
 0x149   :  { %v531_v40 = vadd.f32 %v1317_v33, %v530_v39 }
 0x14b   :  { %v566_v42 = vmax.f32 %v531_v40, 0.0 }
 0x14d   :  { %v580_v43 = vpack.c.bf16 %v566_v42, %v565_v41 }
 0x14f   :  { %666 = vmatmul.bf16.gmra.mxu2 %v580_v43 }
 0x150   :  { %v533_v44 = vpop.f32.mrf.mxu1 }
 0x151   :  { %v534_v45 = vadd.f32 %v1317_v33, %v533_v44 }
 0x153   :  { %v567_v48 = vmax.f32 %v534_v45, 0.0 }
 0x158   :  { %v535_v46 = vpop.f32.mrf.mxu1 }
 0x159   :  { %v536_v47 = vadd.f32 %v1317_v33, %v535_v46 }
 0x15b   :  { %v568_v49 = vmax.f32 %v536_v47, 0.0 }
 0x15d   :  { %v581_v50 = vpack.c.bf16 %v568_v49, %v567_v48 }
 0x15f   :  { %671 = vmatmul.bf16.gmra.mxu2 %v581_v50 }
 0x160   :  { %v538_v51 = vpop.f32.mrf.mxu1 }
 0x161   :  { %v539_v52 = vadd.f32 %v1317_v33, %v538_v51 }
 0x163   :  { %v569_v55 = vmax.f32 %v539_v52, 0.0 }
 0x168   :  { %v540_v53 = vpop.f32.mrf.mxu1 }
 0x169   :  { %v541_v54 = vadd.f32 %v1317_v33, %v540_v53 }
 0x16b   :  { %v570_v58 = vmax.f32 %v541_v54, 0.0 }
 0x16d   :  { %v582_v59 = vpack.c.bf16 %v570_v58, %v569_v55 }
 0x16f   :  { %676 = vmatmul.bf16.gmra.mxu2 %v582_v59 }
 0x170   :  { %v543_v61 = vpop.f32.mrf.mxu1 }
 0x171   :  { %v544_v62 = vadd.f32 %v1317_v33, %v543_v61 }
 0x173   :  { %v571_v1 = vmax.f32 %v544_v62, 0.0 }
 0x178   :  { %v545_v63 = vpop.f32.mrf.mxu1 }
 0x179   :  { %v546_v0 = vadd.f32 %v1317_v33, %v545_v63 }
 0x17b   :  { %v572_v2 = vmax.f32 %v546_v0, 0.0 }
 0x17d   :  { %v583_v3 = vpack.c.bf16 %v572_v2, %v571_v1 }
 0x17f   :  { %681 = vmatmul.bf16.gmra.mxu2 %v583_v3 }
 0x180   :  { %v548_v4 = vpop.f32.mrf.mxu1 }
 0x181   :  { %v549_v5 = vadd.f32 %v1317_v33, %v548_v4 }
 0x183   :  { %v573_v8 = vmax.f32 %v549_v5, 0.0 }
 0x188   :  { %v550_v6 = vpop.f32.mrf.mxu1 }
 0x189   :  { %v551_v7 = vadd.f32 %v1317_v33, %v550_v6 }
 0x18b   :  { %v574_v9 = vmax.f32 %v551_v7, 0.0 }
 0x18d   :  { %v584_v10 = vpack.c.bf16 %v574_v9, %v573_v8 }
 0x18f   :  { %686 = vmatmul.bf16.gmra.mxu2 %v584_v10 }
 0x190   :  { %v553_v12 = vpop.f32.mrf.mxu1 }
 0x191   :  { %v554_v15 = vadd.f32 %v1317_v33, %v553_v12 }
 0x193   :  { %v575_v19 = vmax.f32 %v554_v15, 0.0 }
 0x198   :  { %v555_v16 = vpop.f32.mrf.mxu1 }
 0x199   :  { %v556_v17 = vadd.f32 %v1317_v33, %v555_v16 }
 0x19b   :  { %v576_v20 = vmax.f32 %v556_v17, 0.0 }
 0x19d   :  { %v585_v21 = vpack.c.bf16 %v576_v20, %v575_v19 }
 0x19f   :  { %691 = vmatmul.bf16.gmra.mxu2 %v585_v21 }
 0x1a0   :  { %v558_v22 = vpop.f32.mrf.mxu1 }
 0x1a1   :  { %v559_v25 = vadd.f32 %v1317_v33, %v558_v22 }
 0x1a3   :  { %v577_v29 = vmax.f32 %v559_v25, 0.0 }
 0x1a8   :  { %v560_v26 = vpop.f32.mrf.mxu1 }
 0x1a9   :  { %v561_v28 = vadd.f32 %v1317_v33, %v560_v26  ;;  %v1060_v26 = vld [vmem:[#allocation8 + $0x3] ss:$0 sm:$0xff] }
 0x1ab   :  { %v578_v30 = vmax.f32 %v561_v28, 0.0 }
 0x1ad   :  { %v586_v32 = vpack.c.bf16 %v578_v30, %v577_v29 }
 0x1af   :  { %696 = vmatmul.bf16.gmra.mxu2 %v586_v32 }
 0x1c2   :  { %v662_v56 = vpop.f32.mrf.mxu2 }
 0x1c3   :  { %v663_v35 = vadd.f32 %v1059_v34, %v662_v56 }
 0x1c5   :  { %v702_v60 = vmax.f32 %v663_v35, 0.0 }
 0x1ca   :  { %v664_v57 = vpop.f32.mrf.mxu2 }
 0x1cb   :  { %v665_v36 = vadd.f32 %v1059_v34, %v664_v57 }
 0x1cd   :  { %v703_v37 = vmax.f32 %v665_v36, 0.0 }
 0x1cf   :  { %v718_v38 = vpack.c.bf16 %v703_v37, %v702_v60 }
 0x1d1   :  { %800 = vmatmul.bf16.vlgmr.msra.gmra.mxu3 %v718_v38 }
 0x1d2   :  { %v667_v39 = vpop.f32.mrf.mxu2 }
 0x1d3   :  { %v668_v40 = vadd.f32 %v1059_v34, %v667_v39 }
 0x1d5   :  { %v704_v42 = vmax.f32 %v668_v40, 0.0 }
 0x1da   :  { %v669_v41 = vpop.f32.mrf.mxu2 }
 0x1db   :  { %v670_v33 = vadd.f32 %v1059_v34, %v669_v41 }
 0x1dd   :  { %v705_v43 = vmax.f32 %v670_v33, 0.0 }
 0x1df   :  { %v719_v44 = vpack.c.bf16 %v705_v43, %v704_v42 }
 0x1e1   :  { %805 = vmatmul.bf16.gmra.mxu3 %v719_v44 }
 0x1e2   :  { %v672_v45 = vpop.f32.mrf.mxu2 }
 0x1e3   :  { %v673_v46 = vadd.f32 %v1059_v34, %v672_v45 }
 0x1e5   :  { %v706_v49 = vmax.f32 %v673_v46, 0.0 }
 0x1ea   :  { %v674_v47 = vpop.f32.mrf.mxu2 }
 0x1eb   :  { %v675_v48 = vadd.f32 %v1059_v34, %v674_v47 }
 0x1ed   :  { %v707_v50 = vmax.f32 %v675_v48, 0.0 }
 0x1ef   :  { %v720_v51 = vpack.c.bf16 %v707_v50, %v706_v49 }
 0x1f1   :  { %810 = vmatmul.bf16.gmra.mxu3 %v720_v51 }
 0x1f2   :  { %v677_v52 = vpop.f32.mrf.mxu2 }
 0x1f3   :  { %v678_v53 = vadd.f32 %v1059_v34, %v677_v52 }
 0x1f5   :  { %v708_v58 = vmax.f32 %v678_v53, 0.0 }
 0x1fa   :  { %v679_v54 = vpop.f32.mrf.mxu2 }
 0x1fb   :  { %v680_v55 = vadd.f32 %v1059_v34, %v679_v54 }
 0x1fd   :  { %v709_v59 = vmax.f32 %v680_v55, 0.0 }
 0x1ff   :  { %v721_v61 = vpack.c.bf16 %v709_v59, %v708_v58 }
 0x201   :  { %815 = vmatmul.bf16.gmra.mxu3 %v721_v61 }
 0x202   :  { %v682_v62 = vpop.f32.mrf.mxu2 }
 0x203   :  { %v683_v63 = vadd.f32 %v1059_v34, %v682_v62 }
 0x205   :  { %v710_v2 = vmax.f32 %v683_v63, 0.0 }
 0x20a   :  { %v684_v0 = vpop.f32.mrf.mxu2 }
 0x20b   :  { %v685_v1 = vadd.f32 %v1059_v34, %v684_v0 }
 0x20d   :  { %v711_v3 = vmax.f32 %v685_v1, 0.0 }
 0x20f   :  { %v722_v4 = vpack.c.bf16 %v711_v3, %v710_v2 }
 0x211   :  { %820 = vmatmul.bf16.gmra.mxu3 %v722_v4 }
 0x212   :  { %v687_v5 = vpop.f32.mrf.mxu2 }
 0x213   :  { %v688_v6 = vadd.f32 %v1059_v34, %v687_v5 }
 0x215   :  { %v712_v9 = vmax.f32 %v688_v6, 0.0 }
 0x21a   :  { %v689_v7 = vpop.f32.mrf.mxu2 }
 0x21b   :  { %v690_v8 = vadd.f32 %v1059_v34, %v689_v7 }
 0x21d   :  { %v713_v10 = vmax.f32 %v690_v8, 0.0 }
 0x21f   :  { %v723_v11 = vpack.c.bf16 %v713_v10, %v712_v9 }
 0x221   :  { %825 = vmatmul.bf16.gmra.mxu3 %v723_v11 }
 0x222   :  { %v692_v12 = vpop.f32.mrf.mxu2 }
 0x223   :  { %v693_v13 = vadd.f32 %v1059_v34, %v692_v12 }
 0x225   :  { %v714_v16 = vmax.f32 %v693_v13, 0.0 }
 0x22a   :  { %v694_v14 = vpop.f32.mrf.mxu2 }
 0x22b   :  { %v695_v15 = vadd.f32 %v1059_v34, %v694_v14 }
 0x22d   :  { %v715_v17 = vmax.f32 %v695_v15, 0.0 }
 0x22f   :  { %v724_v18 = vpack.c.bf16 %v715_v17, %v714_v16 }
 0x231   :  { %830 = vmatmul.bf16.gmra.mxu3 %v724_v18 }
 0x232   :  { %v697_v19 = vpop.f32.mrf.mxu2 }
 0x233   :  { %v698_v20 = vadd.f32 %v1059_v34, %v697_v19 }
 0x235   :  { %v716_v23 = vmax.f32 %v698_v20, 0.0 }
 0x23a   :  { %v699_v21 = vpop.f32.mrf.mxu2 }
 0x23b   :  { %v700_v22 = vadd.f32 %v1059_v34, %v699_v21 }
 0x23d   :  { %v717_v24 = vmax.f32 %v700_v22, 0.0 }
 0x23f   :  { %v725_v25 = vpack.c.bf16 %v717_v24, %v716_v23 }
 0x241   :  { %835 = vmatmul.bf16.gmra.mxu3 %v725_v25 }
 0x254   :  { %v801_v27 = vpop.f32.mrf.mxu3 }
 0x255   :  { %v802_v28 = vadd.f32 %v1060_v26, %v801_v27 }
 0x257   :  { %841 = vxpose.xlu2.b32.start [1/16] (narrow) %v802_v28, 8 }
 0x25c   :  { %v803_v29 = vpop.f32.mrf.mxu3 }
 0x25d   :  { %v804_v30 = vadd.f32 %v1060_v26, %v803_v29 }
 0x25f   :  { %842 = vxpose.xlu2.b32.cont [2/16] (narrow) %v804_v30, 8 }
 0x264   :  { %v806_v31 = vpop.f32.mrf.mxu3 }
 0x265   :  { %v807_v32 = vadd.f32 %v1060_v26, %v806_v31 }
 0x267   :  { %843 = vxpose.xlu2.b32.cont [3/16] (narrow) %v807_v32, 8 }
 0x26c   :  { %v808_v56 = vpop.f32.mrf.mxu3 }
 0x26d   :  { %v809_v35 = vadd.f32 %v1060_v26, %v808_v56 }
 0x26f   :  { %844 = vxpose.xlu2.b32.cont [4/16] (narrow) %v809_v35, 8 }
 0x274   :  { %v811_v57 = vpop.f32.mrf.mxu3 }
 0x275   :  { %v812_v36 = vadd.f32 %v1060_v26, %v811_v57 }
 0x277   :  { %845 = vxpose.xlu2.b32.cont [5/16] (narrow) %v812_v36, 8 }
 0x27c   :  { %v813_v34 = vpop.f32.mrf.mxu3 }
 0x27d   :  { %v814_v60 = vadd.f32 %v1060_v26, %v813_v34 }
 0x27f   :  { %846 = vxpose.xlu2.b32.cont [6/16] (narrow) %v814_v60, 8 }
 0x284   :  { %v816_v37 = vpop.f32.mrf.mxu3 }
 0x285   :  { %v817_v38 = vadd.f32 %v1060_v26, %v816_v37 }
 0x287   :  { %847 = vxpose.xlu2.b32.cont [7/16] (narrow) %v817_v38, 8 }
 0x28c   :  { %v818_v39 = vpop.f32.mrf.mxu3 }
 0x28d   :  { %v819_v40 = vadd.f32 %v1060_v26, %v818_v39 }
 0x28f   :  { %848 = vxpose.xlu2.b32.cont [8/16] (narrow) %v819_v40, 8 }
 0x294   :  { %v821_v41 = vpop.f32.mrf.mxu3 }
 0x295   :  { %v822_v33 = vadd.f32 %v1060_v26, %v821_v41 }
 0x297   :  { %849 = vxpose.xlu2.b32.cont [9/16] (narrow) %v822_v33, 8 }
 0x29c   :  { %v823_v42 = vpop.f32.mrf.mxu3 }
 0x29d   :  { %v824_v43 = vadd.f32 %v1060_v26, %v823_v42 }
 0x29f   :  { %850 = vxpose.xlu2.b32.cont [10/16] (narrow) %v824_v43, 8 }
 0x2a4   :  { %v826_v44 = vpop.f32.mrf.mxu3 }
 0x2a5   :  { %v827_v45 = vadd.f32 %v1060_v26, %v826_v44 }
 0x2a7   :  { %851 = vxpose.xlu2.b32.cont [11/16] (narrow) %v827_v45, 8 }
 0x2ac   :  { %v828_v46 = vpop.f32.mrf.mxu3 }
 0x2ad   :  { %v829_v47 = vadd.f32 %v1060_v26, %v828_v46 }
 0x2af   :  { %852 = vxpose.xlu2.b32.cont [12/16] (narrow) %v829_v47, 8 }
 0x2b4   :  { %v831_v48 = vpop.f32.mrf.mxu3 }
 0x2b5   :  { %v832_v49 = vadd.f32 %v1060_v26, %v831_v48 }
 0x2b7   :  { %853 = vxpose.xlu2.b32.cont [13/16] (narrow) %v832_v49, 8 }
 0x2bc   :  { %v833_v50 = vpop.f32.mrf.mxu3 }
 0x2bd   :  { %v834_v51 = vadd.f32 %v1060_v26, %v833_v50 }
 0x2bf   :  { %854 = vxpose.xlu2.b32.cont [14/16] (narrow) %v834_v51, 8 }
 0x2c4   :  { %v836_v52 = vpop.f32.mrf.mxu3 }
 0x2c5   :  { %v837_v53 = vadd.f32 %v1060_v26, %v836_v52 }
 0x2c7   :  { %855 = vxpose.xlu2.b32.cont [15/16] (narrow) %v837_v53, 8 }
 0x2cc   :  { %v838_v54 = vpop.f32.mrf.mxu3 }
 0x2cd   :  { %v839_v55 = vadd.f32 %v1060_v26, %v838_v54 }
 0x2cf   :  { %856 = vxpose.xlu2.b32.end [16/16] (narrow) %v839_v55, 8 }
 0x2f0   :  { %v857_v58 = vpop.trf.xlu2 }
 0x2f1   :  { %873 = vst [vmem:[#allocation10] sm:$0x1] %v857_v58 }
 0x2f2   :  { %884 = dma.vmem_to_hbm [thread:$0]  %s880_s3, 16, %s882_s13, [#allocation4]  }
 0x2f3   :  { %1187 = dma.done.wait [#allocation4], 16  }
 0x2f4   :  { %1188 = vsyncadd [#allocation4], 4294967280 }
 0x2f5   :  { %889 = vsyncpa [#allocation3], 1 }
 0x2f6   :  { %890 = vsyncpa [#allocation6], 1 }
 0x2f7   :  { %891 = vsyncpa [#allocation9], 1 }
 0x2f8   :  { %892 = vsyncpa [#allocation4], 1 }

</bundles_post_ra>
